<compile_context>
chip_gen: v7x
topology: tpu7x:2x2x1
jax: 0.10.0
libtpu: 0.0.40
codegen_flags: <defaults>
</compile_context>

<pallas_src>
import jax
import jax.numpy as jnp
import numpy as np
from jax.experimental import pallas as pl
from jax.experimental.pallas import tpu as pltpu

H1 = 512   # first hidden width
H2 = 64    # second hidden width


def _round_up(n, m):
    return (n + m - 1) // m * m


def arias_mlp_kernel(x_ref, w1_ref, b1_ref, w2_ref, b2_ref, w3_ref, b3_ref,
                     o_ref):
    x = x_ref[...]                                              # [TB, Lp]

    # Linear(L -> 512) + ReLU   (one MXU matmul, M = TB)
    h1 = jnp.dot(x, w1_ref[...],
                 preferred_element_type=jnp.float32) + b1_ref[...]
    h1 = jnp.maximum(h1, 0.0)                                   # [TB, H1]

    # Dropout(0.5): identity at inference.

    # Linear(512 -> 64, padded to 128 lanes) + ReLU
    h2 = jnp.dot(h1, w2_ref[...],
                 preferred_element_type=jnp.float32) + b2_ref[...]
    h2 = jnp.maximum(h2, 0.0)                                   # [TB, H2p]

    # Dropout(0.5): identity at inference.

    # Head: Linear(64 -> n_classes, padded to 128 lanes)
    o_ref[...] = (jnp.dot(h2, w3_ref[...],
                          preferred_element_type=jnp.float32)
                  + b3_ref[...]).astype(o_ref.dtype)


def arias2022_forward(x, params, n_classes):
    """x: [B, C, H, W] (NCHW, like PyTorch). Returns [B, n_classes]."""
    w1, b1, w2, b2, w3, b3 = params        # PyTorch [out, in] weight layout
    B, _, Hh, Ww = x.shape
    L = Hh * Ww

    # glue: channel select + flatten (plain JAX, outside the kernel)
    xf = x[:, 0, :, :].reshape(B, L).astype(jnp.float32)

    # lane-dense padding of narrow dims; batch padded to the batch tile
    Lp = _round_up(L, 128)
    H2p = _round_up(H2, 128)
    NPAD = _round_up(n_classes, 128)
    TB = min(128, _round_up(B, 8))
    Bp = _round_up(B, TB)

    xp = jnp.zeros((Bp, Lp), jnp.float32).at[:B, :L].set(xf)

    # parameter re-layout: transpose to [in, out], zero-pad to lane multiples
    w1k = jnp.zeros((Lp, H1), jnp.float32).at[:L, :].set(
        w1.T.astype(jnp.float32))                                   # [Lp, H1]
    b1k = b1.reshape(1, H1).astype(jnp.float32)
    w2k = jnp.zeros((H1, H2p), jnp.float32).at[:, :H2].set(
        w2.T.astype(jnp.float32))                                   # [H1, H2p]
    b2k = jnp.zeros((1, H2p), jnp.float32).at[:, :H2].set(
        b2.astype(jnp.float32))
    w3k = jnp.zeros((H2p, NPAD), jnp.float32).at[:H2, :n_classes].set(
        w3.T.astype(jnp.float32))                                   # [H2p, NPAD]
    b3k = jnp.zeros((1, NPAD), jnp.float32).at[:, :n_classes].set(
        b3.astype(jnp.float32))

    def resident(shape):
        # weights/biases: same block every grid step -> stay resident in VMEM
        return pl.BlockSpec(shape, lambda i: (0, 0))

    out = pl.pallas_call(
        arias_mlp_kernel,
        out_shape=jax.ShapeDtypeStruct((Bp, NPAD), jnp.float32),
        grid=(Bp // TB,),
        in_specs=[
            pl.BlockSpec((TB, Lp), lambda i: (i, 0)),   # batch-tiled input
            resident((Lp, H1)),
            resident((1, H1)),
            resident((H1, H2p)),
            resident((1, H2p)),
            resident((H2p, NPAD)),
            resident((1, NPAD)),
        ],
        out_specs=pl.BlockSpec((TB, NPAD), lambda i: (i, 0)),
        compiler_params=pltpu.CompilerParams(
            dimension_semantics=("parallel",),
            vmem_limit_bytes=64 << 20),
    )(xp, w1k, b1k, w2k, b2k, w3k, b3k)

    return out[:B, :n_classes]


def ref_forward_np(x, params):
    """NumPy reference matching the PyTorch module (eval mode)."""
    w1, b1, w2, b2, w3, b3 = [np.asarray(p, np.float64) for p in params]
    xf = np.asarray(x, np.float64)[:, 0, :, :].reshape(x.shape[0], -1)
    h1 = np.maximum(xf @ w1.T + b1, 0.0)
    h2 = np.maximum(h1 @ w2.T + b2, 0.0)
    return h2 @ w3.T + b3


if __name__ == "__main__":
    B, C, Hh, Ww = 2, 4, 16, 16
    L = Hh * Ww
    n_classes = 10

    key = jax.random.PRNGKey(0)
    ks = jax.random.split(key, 7)
    w1 = jax.random.normal(ks[0], (H1, L), jnp.float32) * 0.05
    b1 = jax.random.normal(ks[1], (H1,), jnp.float32) * 0.1
    w2 = jax.random.normal(ks[2], (H2, H1), jnp.float32) * 0.05
    b2 = jax.random.normal(ks[3], (H2,), jnp.float32) * 0.1
    w3 = jax.random.normal(ks[4], (n_classes, H2), jnp.float32) * 0.05
    b3 = jax.random.normal(ks[5], (n_classes,), jnp.float32) * 0.1
    x = jax.random.normal(ks[6], (B, C, Hh, Ww), jnp.float32)

    params = (w1, b1, w2, b2, w3, b3)

    out = arias2022_forward(x, params, n_classes)
    out = jax.block_until_ready(out)

    ref = ref_forward_np(x, params)
    np.testing.assert_allclose(np.asarray(out), ref, rtol=1e-3, atol=1e-3)
    print("KERNEL_OK")
</pallas_src>

<mosaic_0001>
module attributes {stable_mosaic.version = 11 : i64} {
  func.func @arias_mlp_kernel(%arg0: i32, %arg1: memref<8x256xf32, #tpu.memory_space<vmem>>, %arg2: memref<256x512xf32, #tpu.memory_space<vmem>>, %arg3: memref<1x512xf32, #tpu.memory_space<vmem>>, %arg4: memref<512x128xf32, #tpu.memory_space<vmem>>, %arg5: memref<1x128xf32, #tpu.memory_space<vmem>>, %arg6: memref<128x128xf32, #tpu.memory_space<vmem>>, %arg7: memref<1x128xf32, #tpu.memory_space<vmem>>, %arg8: memref<8x128xf32, #tpu.memory_space<vmem>>) attributes {dimension_semantics = [#tpu.dimension_semantics<parallel>], iteration_bounds = array<i64: 1>, scalar_prefetch = 0 : i64, scratch_operands = 0 : i64, tpu.core_type = #tpu.core_type<tc>, window_params = [{transform_indices = @transform_0, window_bounds = array<i64: 8, 256>}, {pipeline_mode = #tpu.pipeline_mode<synchronous>, transform_indices = @transform_1, window_bounds = array<i64: 256, 512>}, {pipeline_mode = #tpu.pipeline_mode<synchronous>, transform_indices = @transform_2, window_bounds = array<i64: 1, 512>}, {pipeline_mode = #tpu.pipeline_mode<synchronous>, transform_indices = @transform_3, window_bounds = array<i64: 512, 128>}, {pipeline_mode = #tpu.pipeline_mode<synchronous>, transform_indices = @transform_4, window_bounds = array<i64: 1, 128>}, {pipeline_mode = #tpu.pipeline_mode<synchronous>, transform_indices = @transform_5, window_bounds = array<i64: 128, 128>}, {pipeline_mode = #tpu.pipeline_mode<synchronous>, transform_indices = @transform_6, window_bounds = array<i64: 1, 128>}, {transform_indices = @transform_7, window_bounds = array<i64: 8, 128>}]} {
    %c0 = arith.constant 0 : index
    %c0_0 = arith.constant 0 : index
    %0 = vector.load %arg1[%c0, %c0_0] : memref<8x256xf32, #tpu.memory_space<vmem>>, vector<8x256xf32>
    %c0_1 = arith.constant 0 : index
    %c0_2 = arith.constant 0 : index
    %1 = vector.load %arg2[%c0_1, %c0_2] : memref<256x512xf32, #tpu.memory_space<vmem>>, vector<256x512xf32>
    %cst = arith.constant dense<0.000000e+00> : vector<8x512xf32>
    %2 = tpu.matmul %0, %1, %cst {dimension_numbers = #tpu.dot_dimension_numbers<[1], [0], [0], [1], [0, 0, 1, 1], [], []>} : vector<8x256xf32>, vector<256x512xf32>, vector<8x512xf32> -> vector<8x512xf32>
    %c0_3 = arith.constant 0 : index
    %c0_4 = arith.constant 0 : index
    %3 = vector.load %arg3[%c0_3, %c0_4] : memref<1x512xf32, #tpu.memory_space<vmem>>, vector<1x512xf32>
    %4 = vector.broadcast %3 : vector<1x512xf32> to vector<8x512xf32>
    %5 = arith.addf %2, %4 : vector<8x512xf32>
    %cst_5 = arith.constant 0.000000e+00 : f32
    %6 = vector.broadcast %cst_5 : f32 to vector<8x512xf32>
    %7 = arith.maximumf %5, %6 : vector<8x512xf32>
    %c0_6 = arith.constant 0 : index
    %c0_7 = arith.constant 0 : index
    %8 = vector.load %arg4[%c0_6, %c0_7] : memref<512x128xf32, #tpu.memory_space<vmem>>, vector<512x128xf32>
    %cst_8 = arith.constant dense<0.000000e+00> : vector<8x128xf32>
    %9 = tpu.matmul %7, %8, %cst_8 {dimension_numbers = #tpu.dot_dimension_numbers<[1], [0], [0], [1], [0, 0, 1, 1], [], []>} : vector<8x512xf32>, vector<512x128xf32>, vector<8x128xf32> -> vector<8x128xf32>
    %c0_9 = arith.constant 0 : index
    %c0_10 = arith.constant 0 : index
    %10 = vector.load %arg5[%c0_9, %c0_10] : memref<1x128xf32, #tpu.memory_space<vmem>>, vector<1x128xf32>
    %11 = vector.broadcast %10 : vector<1x128xf32> to vector<8x128xf32>
    %12 = arith.addf %9, %11 : vector<8x128xf32>
    %cst_11 = arith.constant 0.000000e+00 : f32
    %13 = vector.broadcast %cst_11 : f32 to vector<8x128xf32>
    %14 = arith.maximumf %12, %13 : vector<8x128xf32>
    %c0_12 = arith.constant 0 : index
    %c0_13 = arith.constant 0 : index
    %15 = vector.load %arg6[%c0_12, %c0_13] : memref<128x128xf32, #tpu.memory_space<vmem>>, vector<128x128xf32>
    %cst_14 = arith.constant dense<0.000000e+00> : vector<8x128xf32>
    %16 = tpu.matmul %14, %15, %cst_14 {dimension_numbers = #tpu.dot_dimension_numbers<[1], [0], [0], [1], [0, 0, 1, 1], [], []>} : vector<8x128xf32>, vector<128x128xf32>, vector<8x128xf32> -> vector<8x128xf32>
    %c0_15 = arith.constant 0 : index
    %c0_16 = arith.constant 0 : index
    %17 = vector.load %arg7[%c0_15, %c0_16] : memref<1x128xf32, #tpu.memory_space<vmem>>, vector<1x128xf32>
    %18 = vector.broadcast %17 : vector<1x128xf32> to vector<8x128xf32>
    %19 = arith.addf %16, %18 : vector<8x128xf32>
    %c0_17 = arith.constant 0 : index
    %c0_18 = arith.constant 0 : index
    %20 = vector.load %arg8[%c0_17, %c0_18] : memref<8x128xf32, #tpu.memory_space<vmem>>, vector<8x128xf32>
    tpu.vector_store %arg8[%c0_17, %c0_18], %19 {strides = array<i32>} : memref<8x128xf32, #tpu.memory_space<vmem>>, vector<8x128xf32>,
    return
  }
  func.func @transform_0(%arg0: i32) -> (i32, i32) {
    %c0_i32 = arith.constant 0 : i32
    %c0_i32_0 = arith.constant 0 : i32
    return %arg0, %c0_i32 : i32, i32
  }
  func.func @transform_1(%arg0: i32) -> (i32, i32) {
    %c0_i32 = arith.constant 0 : i32
    %c0_i32_0 = arith.constant 0 : i32
    %c0_i32_1 = arith.constant 0 : i32
    return %c0_i32, %c0_i32_0 : i32, i32
  }
  func.func @transform_2(%arg0: i32) -> (i32, i32) {
    %c0_i32 = arith.constant 0 : i32
    %c0_i32_0 = arith.constant 0 : i32
    %c0_i32_1 = arith.constant 0 : i32
    return %c0_i32, %c0_i32_0 : i32, i32
  }
  func.func @transform_3(%arg0: i32) -> (i32, i32) {
    %c0_i32 = arith.constant 0 : i32
    %c0_i32_0 = arith.constant 0 : i32
    %c0_i32_1 = arith.constant 0 : i32
    return %c0_i32, %c0_i32_0 : i32, i32
  }
  func.func @transform_4(%arg0: i32) -> (i32, i32) {
    %c0_i32 = arith.constant 0 : i32
    %c0_i32_0 = arith.constant 0 : i32
    %c0_i32_1 = arith.constant 0 : i32
    return %c0_i32, %c0_i32_0 : i32, i32
  }
  func.func @transform_5(%arg0: i32) -> (i32, i32) {
    %c0_i32 = arith.constant 0 : i32
    %c0_i32_0 = arith.constant 0 : i32
    %c0_i32_1 = arith.constant 0 : i32
    return %c0_i32, %c0_i32_0 : i32, i32
  }
  func.func @transform_6(%arg0: i32) -> (i32, i32) {
    %c0_i32 = arith.constant 0 : i32
    %c0_i32_0 = arith.constant 0 : i32
    %c0_i32_1 = arith.constant 0 : i32
    return %c0_i32, %c0_i32_0 : i32, i32
  }
  func.func @transform_7(%arg0: i32) -> (i32, i32) {
    %c0_i32 = arith.constant 0 : i32
    %c0_i32_0 = arith.constant 0 : i32
    return %arg0, %c0_i32 : i32, i32
  }
}

</mosaic_0001>

<bundles_post_ra>
// kernel: tpu_custom_call.1
= control target key start
LH: loop header
LB: loop body
LE: loop exit
PB: predicated region body
PF: predicated region fallthrough
CT: control target
= control target key end

     0   :  { %12 = vsyncpa [#allocation3], 0  ;;  %s1428_s0 = inlined_call_operand.hbm [shape: f32[8,256], index: 0, kind: input, shape index: {}]   ;;  %s1429_s1 = inlined_call_operand.hbm [shape: f32[256,512], index: 1, kind: input, shape index: {}]   ;;  %s1430_s2 = inlined_call_operand.hbm [shape: f32[1,512], index: 2, kind: input, shape index: {}]   ;;  %s1431_s3 = inlined_call_operand.hbm [shape: f32[512,128], index: 3, kind: input, shape index: {}]   ;;  %s1432_s4 = inlined_call_operand.hbm [shape: f32[1,128], index: 4, kind: input, shape index: {}]   ;;  %s1433_s5 = inlined_call_operand.hbm [shape: f32[128,128], index: 5, kind: input, shape index: {}]   ;;  %s1434_s6 = inlined_call_operand.hbm [shape: f32[1,128], index: 6, kind: input, shape index: {}]   ;;  %s1435_s7 = inlined_call_operand.hbm [shape: f32[8,128], index: 7, kind: output, shape index: {}]  }
   0x1   :  { %13 = vsyncpa [#allocation6], 0 }
   0x2   :  { %14 = vsyncpa [#allocation9], 0 }
   0x3   :  { %15 = vsyncpa [#allocation12], 0 }
   0x4   :  { %16 = vsyncpa [#allocation4], 0  ;;  %s1277_s24 = smov [#allocation5]   ;;  %s1091_s28 = scalar_lea.hbm %s1429_s1, 16384 }
   0x5   :  { %s32_s25 = sshll.u32 %s1277_s24, 4  ;;  %p1092_p0 = scmp.ne.s32.totalorder %s1429_s1, %s1091_s28  ;;  %s33_s25 = int_to_ptr.vmem [resolvable:$true] %s32_s25 }
   0x6   :  { %p1095_p1 = scmp.lt.u32.totalorder %s1091_s28, %s1429_s1 }
   0x8   :  { %p1097_p2 = pnand %p1095_p1, %p1092_p0 }
   0xa   :  { %1100 = shalt.err (!%p1097_p2)
}
   0xb   :  { %s1101_s10 = scalar_lea.vmem %s33_s25, 16384  ;;  %p1106_p4 = scmp.lt.s32.totalorder %s33_s25, %s33_s25 }
   0xc   :  { %p1102_p3 = scmp.ne.s32.totalorder %s33_s25, %s1101_s10  ;;  %p1107_p5 = scmp.lt.s32.totalorder %s1101_s10, %s1101_s10 }
   0xe   :  { %p1108_p6 = por %p1107_p5, %p1106_p4 }
  0x10   :  { %p1109_p7 = pnand %p1108_p6, %p1102_p3 }
  0x12   :  { %1112 = shalt.err (!%p1109_p7)
}
  0x13   :  { %s1278_s11 = smov 512   ;;  %s1279_s12 = smov 32  }
  0x14   :  { %38 = dma.hbm_to_vmem [thread:$0]  %s1429_s1, 16384, %s33_s25, [#allocation6], %s1278_s11, %s1278_s11, %s1279_s12  }
  0x15   :  { %s1280_s15 = smov [#allocation8]   ;;  %s1113_s19 = scalar_lea.hbm %s1431_s3, 8192 }
  0x16   :  { %s54_s16 = sshll.u32 %s1280_s15, 4  ;;  %p1114_p8 = scmp.ne.s32.totalorder %s1431_s3, %s1113_s19  ;;  %s55_s16 = int_to_ptr.vmem [resolvable:$true] %s54_s16 }
  0x17   :  { %p1117_p9 = scmp.lt.u32.totalorder %s1113_s19, %s1431_s3 }
  0x19   :  { %p1119_p10 = pnand %p1117_p9, %p1114_p8 }
  0x1b   :  { %1122 = shalt.err (!%p1119_p10)
}
  0x1c   :  { %s1123_s24 = scalar_lea.vmem %s55_s16, 8192  ;;  %p1128_p12 = scmp.lt.s32.totalorder %s55_s16, %s55_s16 }
  0x1d   :  { %p1124_p11 = scmp.ne.s32.totalorder %s55_s16, %s1123_s24  ;;  %p1129_p13 = scmp.lt.s32.totalorder %s1123_s24, %s1123_s24 }
  0x1f   :  { %p1130_p0 = por %p1129_p13, %p1128_p12 }
  0x21   :  { %p1131_p1 = pnand %p1130_p0, %p1124_p11 }
  0x23   :  { %1134 = shalt.err (!%p1131_p1)
}
  0x24   :  { %s1281_s1 = smov 128   ;;  %s1282_s25 = smov 8  }
  0x25   :  { %60 = dma.hbm_to_vmem [thread:$0]  %s1431_s3, 8192, %s55_s16, [#allocation9], %s1281_s1, %s1281_s1, %s1282_s25  }
  0x26   :  { %s1283_s28 = smov [#allocation11]   ;;  %s1284_s30 = smov [#allocation2]  }
  0x27   :  { %s76_s29 = sshll.u32 %s1283_s28, 4  ;;  %s23_s8 = sshll.u32 %s1284_s30, 4  ;;  %s77_s29 = int_to_ptr.vmem [resolvable:$true] %s76_s29  ;;  %s24_s8 = int_to_ptr.vmem [resolvable:$true] %s23_s8 }
  0x28   :  { %s1135_s11 = scalar_lea.hbm %s1433_s5, 2048 }
  0x29   :  { %p1136_p2 = scmp.ne.s32.totalorder %s1433_s5, %s1135_s11  ;;  %p1139_p3 = scmp.lt.u32.totalorder %s1135_s11, %s1433_s5 }
  0x2b   :  { %p1141_p4 = pnand %p1139_p3, %p1136_p2 }
  0x2d   :  { %1144 = shalt.err (!%p1141_p4)
}
  0x2e   :  { %s1145_s3 = scalar_lea.vmem %s77_s29, 2048  ;;  %p1150_p6 = scmp.lt.s32.totalorder %s77_s29, %s77_s29 }
  0x2f   :  { %p1146_p5 = scmp.ne.s32.totalorder %s77_s29, %s1145_s3  ;;  %p1151_p7 = scmp.lt.s32.totalorder %s1145_s3, %s1145_s3 }
  0x31   :  { %p1152_p8 = por %p1151_p7, %p1150_p6 }
  0x33   :  { %p1153_p9 = pnand %p1152_p8, %p1146_p5 }
  0x35   :  { %1156 = shalt.err (!%p1153_p9)
}
  0x36   :  { %82 = dma.hbm_to_vmem [thread:$0]  %s1433_s5, 2048, %s77_s29, [#allocation12], %s1281_s1, %s1281_s1, %s1282_s25  }
  0x37   :  { %s1157_s20 = scalar_lea.hbm %s1428_s0, 256 }
  0x38   :  { %p1158_p10 = scmp.ne.s32.totalorder %s1428_s0, %s1157_s20  ;;  %p1161_p11 = scmp.lt.u32.totalorder %s1157_s20, %s1428_s0 }
  0x3a   :  { %p1163_p12 = pnand %p1161_p11, %p1158_p10 }
  0x3c   :  { %1166 = shalt.err (!%p1163_p12)
}
  0x3d   :  { %s1167_s26 = scalar_lea.vmem %s24_s8, 256  ;;  %p1172_p0 = scmp.lt.s32.totalorder %s24_s8, %s24_s8 }
  0x3e   :  { %p1168_p13 = scmp.ne.s32.totalorder %s24_s8, %s1167_s26  ;;  %p1173_p1 = scmp.lt.s32.totalorder %s1167_s26, %s1167_s26 }
  0x40   :  { %p1174_p2 = por %p1173_p1, %p1172_p0 }
  0x42   :  { %p1175_p3 = pnand %p1174_p2, %p1168_p13 }
  0x44   :  { %1178 = shalt.err (!%p1175_p3)
}
  0x45   :  { %26 = dma.hbm_to_vmem [thread:$0]  %s1428_s0, 256, %s24_s8, [#allocation3]  }
  0x46   :  { %s1285_s25 = smov [#allocation7]   ;;  %s1286_s28 = smov [#allocation10]  }
  0x47   :  { %s45_s27 = sshll.u32 %s1285_s25, 4  ;;  %s67_s29 = sshll.u32 %s1286_s28, 4  ;;  %s46_s27 = int_to_ptr.vmem [resolvable:$true] %s45_s27  ;;  %s68_s29 = int_to_ptr.vmem [resolvable:$true] %s67_s29 }
  0x48   :  { %s1179_s10 = scalar_lea.hbm %s1430_s2, 64 }
  0x49   :  { %p1180_p4 = scmp.ne.s32.totalorder %s1430_s2, %s1179_s10  ;;  %p1183_p5 = scmp.lt.u32.totalorder %s1179_s10, %s1430_s2 }
  0x4b   :  { %p1185_p6 = pnand %p1183_p5, %p1180_p4 }
  0x4d   :  { %1188 = shalt.err (!%p1185_p6)
}
  0x4e   :  { %s1189_s0 = scalar_lea.vmem %s46_s27, 64  ;;  %p1194_p8 = scmp.lt.s32.totalorder %s46_s27, %s46_s27 }
  0x4f   :  { %p1190_p7 = scmp.ne.s32.totalorder %s46_s27, %s1189_s0  ;;  %p1195_p9 = scmp.lt.s32.totalorder %s1189_s0, %s1189_s0 }
  0x51   :  { %p1196_p10 = por %p1195_p9, %p1194_p8 }
  0x53   :  { %p1197_p11 = pnand %p1196_p10, %p1190_p7 }
  0x55   :  { %1200 = shalt.err (!%p1197_p11)
}
  0x56   :  { %48 = dma.hbm_to_vmem [thread:$0]  %s1430_s2, 64, %s46_s27, [#allocation6]  }
  0x57   :  { %s1201_s17 = scalar_lea.hbm %s1432_s4, 16 }
  0x58   :  { %p1202_p12 = scmp.ne.s32.totalorder %s1432_s4, %s1201_s17  ;;  %p1205_p13 = scmp.lt.u32.totalorder %s1201_s17, %s1432_s4 }
  0x5a   :  { %p1207_p0 = pnand %p1205_p13, %p1202_p12 }
  0x5c   :  { %1210 = shalt.err (!%p1207_p0)
}
  0x5d   :  { %s1211_s22 = scalar_lea.vmem %s68_s29, 16  ;;  %s1215_s23 = scalar_lea.vmem %s68_s29, 32 }
  0x5e   :  { %p1212_p1 = scmp.ne.s32.totalorder %s68_s29, %s1211_s22  ;;  %p1216_p2 = scmp.lt.s32.totalorder %s68_s29, %s68_s29 }
  0x5f   :  { %p1217_p3 = scmp.lt.s32.totalorder %s1215_s23, %s1211_s22 }
  0x61   :  { %p1218_p4 = por %p1217_p3, %p1216_p2 }
  0x63   :  { %p1219_p5 = pnand %p1218_p4, %p1212_p1 }
  0x65   :  { %1222 = shalt.err (!%p1219_p5)
}
  0x66   :  { %70 = dma.hbm_to_vmem [thread:$0]  %s1432_s4, 16, %s68_s29, [#allocation9]  }
  0x67   :  { %s1287_s26 = smov [#allocation13]   ;;  %s1223_s27 = scalar_lea.hbm %s1434_s6, 16 }
  0x68   :  { %s89_s5 = sshll.u32 %s1287_s26, 4  ;;  %p1224_p6 = scmp.ne.s32.totalorder %s1434_s6, %s1223_s27  ;;  %s90_s5 = int_to_ptr.vmem [resolvable:$true] %s89_s5 }
  0x69   :  { %p1227_p7 = scmp.lt.u32.totalorder %s1223_s27, %s1434_s6 }
  0x6b   :  { %p1229_p8 = pnand %p1227_p7, %p1224_p6 }
  0x6d   :  { %1232 = shalt.err (!%p1229_p8)
}
  0x6e   :  { %s1233_s11 = scalar_lea.vmem %s90_s5, 16  ;;  %s1237_s4 = scalar_lea.vmem %s90_s5, 32 }
  0x6f   :  { %p1234_p9 = scmp.ne.s32.totalorder %s90_s5, %s1233_s11  ;;  %p1238_p10 = scmp.lt.s32.totalorder %s90_s5, %s90_s5 }
  0x70   :  { %p1239_p11 = scmp.lt.s32.totalorder %s1237_s4, %s1233_s11 }
  0x72   :  { %p1240_p12 = por %p1239_p11, %p1238_p10 }
  0x74   :  { %p1241_p13 = pnand %p1240_p12, %p1234_p9 }
  0x76   :  { %1244 = shalt.err (!%p1241_p13)
}
  0x77   :  { %92 = dma.hbm_to_vmem [thread:$0]  %s1434_s6, 16, %s90_s5, [#allocation12]  }
  0x78   :  { %1267 = dma.done.wait [#allocation3], 256  }
  0x79   :  { %1268 = vsyncadd [#allocation3], 4294967040 }
  0x7a   :  { %1269 = dma.done.wait [#allocation6], 16448  }
  0x7b   :  { %1270 = vsyncadd [#allocation6], 4294950848 }
  0x7c   :  { %1271 = dma.done.wait [#allocation9], 8208  }
  0x7d   :  { %1272 = vsyncadd [#allocation9], 4294959088 }
  0x7e   :  { %1273 = dma.done.wait [#allocation12], 2064  }
  0x7f   :  { %1274 = vsyncadd [#allocation12], 4294965232  ;;  %v117_v0 = vld [vmem:[#allocation5 + $0x8] sm:$0xff]  ;;  %v119_v2 = vld [vmem:[#allocation5 + $0x18] sm:$0xff]  ;;  %vm1289_vm0 = vmmov 0   ;;  %s1291_s6 = smov [#allocation14]  }
  0x80   :  { %v121_v1 = vld [vmem:[#allocation5 + $0x28] sm:$0xff]  ;;  %v123_v4 = vld [vmem:[#allocation5 + $0x38] sm:$0xff]  ;;  %v116_v5 = vld [vmem:[#allocation5] sm:$0xff]  ;;  %s724_s13 = sshll.u32 %s1291_s6, 4  ;;  %s725_s13 = int_to_ptr.vmem [resolvable:$true] %s724_s13 }
  0x81   :  { %v860_v3 = vpack.c.bf16 %v121_v1, %v117_v0  ;;  %v120_v6 = vld [vmem:[#allocation5 + $0x20] sm:$0xff]  ;;  %v924_v7 = vpack.c.bf16 %v123_v4, %v119_v2  ;;  %v118_v9 = vld [vmem:[#allocation5 + $0x10] sm:$0xff]  ;;  %v125_v11 = vld [vmem:[#allocation5 + $0x48] sm:$0xff]  ;;  %s1245_s14 = scalar_lea.vmem %s725_s13, 128  ;;  %p1250_p1 = scmp.lt.s32.totalorder %s725_s13, %s725_s13 }
  0x82   :  { %v862_v8 = vpack.c.bf16 %v120_v6, %v116_v5  ;;  %v122_v10 = vld [vmem:[#allocation5 + $0x30] sm:$0xff]  ;;  %v129_v13 = vld [vmem:[#allocation5 + $0x68] sm:$0xff]  ;;  %v127_v14 = vld [vmem:[#allocation5 + $0x58] sm:$0xff]  ;;  %p1246_p0 = scmp.ne.s32.totalorder %s725_s13, %s1245_s14  ;;  %p1251_p2 = scmp.lt.s32.totalorder %s1245_s14, %s1245_s14 }
  0x83   :  { %861 = vmatprep.subr.bf16.mxu0 %v860_v3  ;;  %v926_v12 = vpack.c.bf16 %v122_v10, %v118_v9  ;;  %v131_v15 = vld [vmem:[#allocation5 + $0x78] sm:$0xff]  ;;  %925 = vmatprep.subr.bf16.mxu1 %v924_v7  ;;  %v864_v16 = vpack.c.bf16 %v129_v13, %v125_v11  ;;  %v124_v18 = vld [vmem:[#allocation5 + $0x40] sm:$0xff]  ;;  %v126_v20 = vld [vmem:[#allocation5 + $0x50] sm:$0xff] }
  0x84   :  { %863 = vmatpush1.bf16.msra.mxu0 %v862_v8  ;;  %v928_v17 = vpack.c.bf16 %v131_v15, %v127_v14  ;;  %v128_v19 = vld [vmem:[#allocation5 + $0x60] sm:$0xff]  ;;  %v130_v22 = vld [vmem:[#allocation5 + $0x70] sm:$0xff]  ;;  %v133_v23 = vld [vmem:[#allocation5 + $0x88] sm:$0xff]  ;;  %p1252_p3 = por %p1251_p2, %p1250_p1 }
  0x85   :  { %927 = vmatpush1.bf16.msra.mxu1 %v926_v12  ;;  %v866_v21 = vpack.c.bf16 %v128_v19, %v124_v18  ;;  %v137_v24 = vld [vmem:[#allocation5 + $0xa8] sm:$0xff]  ;;  %865 = vmatprep.subr.bf16.mxu0 %v864_v16  ;;  %v930_v25 = vpack.c.bf16 %v130_v22, %v126_v20  ;;  %v135_v27 = vld [vmem:[#allocation5 + $0x98] sm:$0xff]  ;;  %v132_v29 = vld [vmem:[#allocation5 + $0x80] sm:$0xff] }
  0x86   :  { %929 = vmatprep.subr.bf16.mxu1 %v928_v17  ;;  %v868_v26 = vpack.c.bf16 %v137_v24, %v133_v23  ;;  %v139_v28 = vld [vmem:[#allocation5 + $0xb8] sm:$0xff]  ;;  %v136_v31 = vld [vmem:[#allocation5 + $0xa0] sm:$0xff]  ;;  %v134_v32 = vld [vmem:[#allocation5 + $0x90] sm:$0xff]  ;;  %p1253_p4 = pnand %p1252_p3, %p1246_p0 }
  0x87   :  { %v932_v30 = vpack.c.bf16 %v139_v28, %v135_v27  ;;  %v138_v33 = vld [vmem:[#allocation5 + $0xb0] sm:$0xff]  ;;  %v870_v34 = vpack.c.bf16 %v136_v31, %v132_v29  ;;  %v141_v35 = vld [vmem:[#allocation5 + $0xc8] sm:$0xff]  ;;  %v143_v37 = vld [vmem:[#allocation5 + $0xd8] sm:$0xff] }
  0x88   :  { %867 = vmatpush1.bf16.msra.mxu0 %v866_v21  ;;  %v145_v36 = vld [vmem:[#allocation5 + $0xe8] sm:$0xff]  ;;  %v934_v38 = vpack.c.bf16 %v138_v33, %v134_v32  ;;  %v147_v40 = vld [vmem:[#allocation5 + $0xf8] sm:$0xff]  ;;  %v140_v41 = vld [vmem:[#allocation5 + $0xc0] sm:$0xff] }
  0x89   :  { %931 = vmatpush1.bf16.msra.mxu1 %v930_v25  ;;  %869 = vmatprep.subr.bf16.mxu0 %v868_v26  ;;  %v872_v39 = vpack.c.bf16 %v145_v36, %v141_v35  ;;  %v144_v42 = vld [vmem:[#allocation5 + $0xe0] sm:$0xff]  ;;  %v936_v43 = vpack.c.bf16 %v147_v40, %v143_v37  ;;  %v142_v44 = vld [vmem:[#allocation5 + $0xd0] sm:$0xff]  ;;  %v149_v46 = vld [vmem:[#allocation5 + $0x108] sm:$0xff] }
  0x8a   :  { %933 = vmatprep.subr.bf16.mxu1 %v932_v30  ;;  %v146_v45 = vld [vmem:[#allocation5 + $0xf0] sm:$0xff]  ;;  %v153_v47 = vld [vmem:[#allocation5 + $0x128] sm:$0xff]  ;;  %v151_v48 = vld [vmem:[#allocation5 + $0x118] sm:$0xff]  ;;  %v874_v50 = vpack.c.bf16 %v144_v42, %v140_v41 }
  0x8b   :  { %v155_v49 = vld [vmem:[#allocation5 + $0x138] sm:$0xff]  ;;  %v938_v51 = vpack.c.bf16 %v146_v45, %v142_v44  ;;  %v876_v52 = vpack.c.bf16 %v153_v47, %v149_v46  ;;  %v148_v53 = vld [vmem:[#allocation5 + $0x100] sm:$0xff]  ;;  %v150_v55 = vld [vmem:[#allocation5 + $0x110] sm:$0xff] }
  0x8c   :  { %871 = vmatpush1.bf16.msra.mxu0 %v870_v34  ;;  %v152_v54 = vld [vmem:[#allocation5 + $0x120] sm:$0xff]  ;;  %v940_v56 = vpack.c.bf16 %v155_v49, %v151_v48  ;;  %v154_v57 = vld [vmem:[#allocation5 + $0x130] sm:$0xff]  ;;  %v157_v58 = vld [vmem:[#allocation5 + $0x148] sm:$0xff] }
  0x8d   :  { %935 = vmatpush1.bf16.msra.mxu1 %v934_v38  ;;  %873 = vmatprep.subr.bf16.mxu0 %v872_v39  ;;  %v161_v59 = vld [vmem:[#allocation5 + $0x168] sm:$0xff]  ;;  %v159_v60 = vld [vmem:[#allocation5 + $0x158] sm:$0xff]  ;;  %v878_v62 = vpack.c.bf16 %v152_v54, %v148_v53  ;;  %v942_v63 = vpack.c.bf16 %v154_v57, %v150_v55  ;;  %v156_v1 = vld [vmem:[#allocation5 + $0x140] sm:$0xff] }
  0x8e   :  { %937 = vmatprep.subr.bf16.mxu1 %v936_v43  ;;  %v163_v61 = vld [vmem:[#allocation5 + $0x178] sm:$0xff]  ;;  %v880_v0 = vpack.c.bf16 %v161_v59, %v157_v58  ;;  %v160_v2 = vld [vmem:[#allocation5 + $0x160] sm:$0xff]  ;;  %v158_v3 = vld [vmem:[#allocation5 + $0x150] sm:$0xff] }
  0x8f   :  { %v944_v4 = vpack.c.bf16 %v163_v61, %v159_v60  ;;  %v162_v5 = vld [vmem:[#allocation5 + $0x170] sm:$0xff]  ;;  %v165_v6 = vld [vmem:[#allocation5 + $0x188] sm:$0xff]  ;;  %v167_v8 = vld [vmem:[#allocation5 + $0x198] sm:$0xff]  ;;  %v882_v10 = vpack.c.bf16 %v160_v2, %v156_v1 }
  0x90   :  { %875 = vmatpush1.bf16.msra.mxu0 %v874_v50  ;;  %v169_v7 = vld [vmem:[#allocation5 + $0x1a8] sm:$0xff]  ;;  %v171_v9 = vld [vmem:[#allocation5 + $0x1b8] sm:$0xff]  ;;  %v946_v11 = vpack.c.bf16 %v162_v5, %v158_v3  ;;  %v164_v13 = vld [vmem:[#allocation5 + $0x180] sm:$0xff] }
  0x91   :  { %939 = vmatpush1.bf16.msra.mxu1 %v938_v51  ;;  %877 = vmatprep.subr.bf16.mxu0 %v876_v52  ;;  %v884_v12 = vpack.c.bf16 %v169_v7, %v165_v6  ;;  %v168_v14 = vld [vmem:[#allocation5 + $0x1a0] sm:$0xff]  ;;  %v166_v15 = vld [vmem:[#allocation5 + $0x190] sm:$0xff]  ;;  %v948_v16 = vpack.c.bf16 %v171_v9, %v167_v8  ;;  %v173_v18 = vld [vmem:[#allocation5 + $0x1c8] sm:$0xff] }
  0x92   :  { %941 = vmatprep.subr.bf16.mxu1 %v940_v56  ;;  %v170_v17 = vld [vmem:[#allocation5 + $0x1b0] sm:$0xff]  ;;  %v177_v19 = vld [vmem:[#allocation5 + $0x1e8] sm:$0xff]  ;;  %v175_v20 = vld [vmem:[#allocation5 + $0x1d8] sm:$0xff]  ;;  %v886_v22 = vpack.c.bf16 %v168_v14, %v164_v13 }
  0x93   :  { %v179_v21 = vld [vmem:[#allocation5 + $0x1f8] sm:$0xff]  ;;  %v950_v23 = vpack.c.bf16 %v170_v17, %v166_v15  ;;  %v888_v24 = vpack.c.bf16 %v177_v19, %v173_v18  ;;  %v172_v25 = vld [vmem:[#allocation5 + $0x1c0] sm:$0xff]  ;;  %v174_v27 = vld [vmem:[#allocation5 + $0x1d0] sm:$0xff] }
  0x94   :  { %879 = vmatpush1.bf16.msra.mxu0 %v878_v62  ;;  %v176_v26 = vld [vmem:[#allocation5 + $0x1e0] sm:$0xff]  ;;  %v952_v28 = vpack.c.bf16 %v179_v21, %v175_v20  ;;  %v178_v29 = vld [vmem:[#allocation5 + $0x1f0] sm:$0xff]  ;;  %v181_v30 = vld [vmem:[#allocation5 + $0x208] sm:$0xff] }
  0x95   :  { %943 = vmatpush1.bf16.msra.mxu1 %v942_v63  ;;  %881 = vmatprep.subr.bf16.mxu0 %v880_v0  ;;  %v185_v31 = vld [vmem:[#allocation5 + $0x228] sm:$0xff]  ;;  %v183_v32 = vld [vmem:[#allocation5 + $0x218] sm:$0xff]  ;;  %v890_v34 = vpack.c.bf16 %v176_v26, %v172_v25  ;;  %v954_v35 = vpack.c.bf16 %v178_v29, %v174_v27  ;;  %v180_v37 = vld [vmem:[#allocation5 + $0x200] sm:$0xff] }
  0x96   :  { %945 = vmatprep.subr.bf16.mxu1 %v944_v4  ;;  %v187_v33 = vld [vmem:[#allocation5 + $0x238] sm:$0xff]  ;;  %v892_v36 = vpack.c.bf16 %v185_v31, %v181_v30  ;;  %v184_v38 = vld [vmem:[#allocation5 + $0x220] sm:$0xff]  ;;  %v182_v39 = vld [vmem:[#allocation5 + $0x210] sm:$0xff] }
  0x97   :  { %v956_v40 = vpack.c.bf16 %v187_v33, %v183_v32  ;;  %v186_v41 = vld [vmem:[#allocation5 + $0x230] sm:$0xff]  ;;  %v189_v42 = vld [vmem:[#allocation5 + $0x248] sm:$0xff]  ;;  %v191_v44 = vld [vmem:[#allocation5 + $0x258] sm:$0xff]  ;;  %v894_v46 = vpack.c.bf16 %v184_v38, %v180_v37 }
  0x98   :  { %883 = vmatpush1.bf16.msra.mxu0 %v882_v10  ;;  %v193_v43 = vld [vmem:[#allocation5 + $0x268] sm:$0xff]  ;;  %v195_v45 = vld [vmem:[#allocation5 + $0x278] sm:$0xff]  ;;  %v958_v47 = vpack.c.bf16 %v186_v41, %v182_v39  ;;  %v188_v49 = vld [vmem:[#allocation5 + $0x240] sm:$0xff] }
  0x99   :  { %947 = vmatpush1.bf16.msra.mxu1 %v946_v11  ;;  %885 = vmatprep.subr.bf16.mxu0 %v884_v12  ;;  %v896_v48 = vpack.c.bf16 %v193_v43, %v189_v42  ;;  %v192_v50 = vld [vmem:[#allocation5 + $0x260] sm:$0xff]  ;;  %v190_v51 = vld [vmem:[#allocation5 + $0x250] sm:$0xff]  ;;  %v960_v52 = vpack.c.bf16 %v195_v45, %v191_v44  ;;  %v197_v54 = vld [vmem:[#allocation5 + $0x288] sm:$0xff] }
  0x9a   :  { %949 = vmatprep.subr.bf16.mxu1 %v948_v16  ;;  %v194_v53 = vld [vmem:[#allocation5 + $0x270] sm:$0xff]  ;;  %v201_v55 = vld [vmem:[#allocation5 + $0x2a8] sm:$0xff]  ;;  %v199_v56 = vld [vmem:[#allocation5 + $0x298] sm:$0xff]  ;;  %v898_v58 = vpack.c.bf16 %v192_v50, %v188_v49 }
  0x9b   :  { %v203_v57 = vld [vmem:[#allocation5 + $0x2b8] sm:$0xff]  ;;  %v962_v59 = vpack.c.bf16 %v194_v53, %v190_v51  ;;  %v900_v60 = vpack.c.bf16 %v201_v55, %v197_v54  ;;  %v196_v61 = vld [vmem:[#allocation5 + $0x280] sm:$0xff]  ;;  %v198_v63 = vld [vmem:[#allocation5 + $0x290] sm:$0xff] }
  0x9c   :  { %887 = vmatpush1.bf16.msra.mxu0 %v886_v22  ;;  %v200_v62 = vld [vmem:[#allocation5 + $0x2a0] sm:$0xff]  ;;  %v964_v0 = vpack.c.bf16 %v203_v57, %v199_v56  ;;  %v202_v1 = vld [vmem:[#allocation5 + $0x2b0] sm:$0xff]  ;;  %v205_v2 = vld [vmem:[#allocation5 + $0x2c8] sm:$0xff] }
  0x9d   :  { %951 = vmatpush1.bf16.msra.mxu1 %v950_v23  ;;  %889 = vmatprep.subr.bf16.mxu0 %v888_v24  ;;  %v209_v3 = vld [vmem:[#allocation5 + $0x2e8] sm:$0xff]  ;;  %v207_v4 = vld [vmem:[#allocation5 + $0x2d8] sm:$0xff]  ;;  %v902_v6 = vpack.c.bf16 %v200_v62, %v196_v61  ;;  %v204_v7 = vld [vmem:[#allocation5 + $0x2c0] sm:$0xff]  ;;  %v966_v8 = vpack.c.bf16 %v202_v1, %v198_v63 }
  0x9e   :  { %953 = vmatprep.subr.bf16.mxu1 %v952_v28  ;;  %v211_v5 = vld [vmem:[#allocation5 + $0x2f8] sm:$0xff]  ;;  %v904_v9 = vpack.c.bf16 %v209_v3, %v205_v2  ;;  %v208_v10 = vld [vmem:[#allocation5 + $0x2e0] sm:$0xff]  ;;  %v206_v11 = vld [vmem:[#allocation5 + $0x2d0] sm:$0xff] }
  0x9f   :  { %v210_v12 = vld [vmem:[#allocation5 + $0x2f0] sm:$0xff]  ;;  %v968_v13 = vpack.c.bf16 %v211_v5, %v207_v4  ;;  %v213_v14 = vld [vmem:[#allocation5 + $0x308] sm:$0xff]  ;;  %v115_v16 = vld [vmem:[#allocation2 + $0x8] sm:$0xff]  ;;  %v906_v19 = vpack.c.bf16 %v208_v10, %v204_v7 }
  0xa0   :  { %891 = vmatpush1.bf16.msra.mxu0 %v890_v34  ;;  %v217_v15 = vld [vmem:[#allocation5 + $0x328] sm:$0xff]  ;;  %v215_v17 = vld [vmem:[#allocation5 + $0x318] sm:$0xff]  ;;  %330 = vmatprep.mubr.f32.mxu0 %v115_v16  ;;  %v970_v20 = vpack.c.bf16 %v210_v12, %v206_v11  ;;  %v212_v22 = vld [vmem:[#allocation5 + $0x300] sm:$0xff] }
  0xa1   :  { %955 = vmatpush1.bf16.msra.mxu1 %v954_v35  ;;  %893 = vmatprep.subr.bf16.mxu0 %v892_v36  ;;  %v219_v18 = vld [vmem:[#allocation5 + $0x338] sm:$0xff]  ;;  %v908_v21 = vpack.c.bf16 %v217_v15, %v213_v14  ;;  %v216_v23 = vld [vmem:[#allocation5 + $0x320] sm:$0xff]  ;;  %v214_v24 = vld [vmem:[#allocation5 + $0x310] sm:$0xff] }
  0xa2   :  { %957 = vmatprep.subr.bf16.mxu1 %v956_v40  ;;  %401 = vmatprep.mubr.f32.mxu1 %v115_v16  ;;  %v972_v25 = vpack.c.bf16 %v219_v18, %v215_v17  ;;  %v218_v26 = vld [vmem:[#allocation5 + $0x330] sm:$0xff]  ;;  %v221_v27 = vld [vmem:[#allocation5 + $0x348] sm:$0xff]  ;;  %v223_v29 = vld [vmem:[#allocation5 + $0x358] sm:$0xff]  ;;  %v910_v31 = vpack.c.bf16 %v216_v23, %v212_v22 }
  0xa3   :  { %v225_v28 = vld [vmem:[#allocation5 + $0x368] sm:$0xff]  ;;  %v227_v30 = vld [vmem:[#allocation5 + $0x378] sm:$0xff]  ;;  %v974_v32 = vpack.c.bf16 %v218_v26, %v214_v24  ;;  %v220_v34 = vld [vmem:[#allocation5 + $0x340] sm:$0xff] }
  0xa4   :  { %895 = vmatpush1.bf16.msra.mxu0 %v894_v46  ;;  %v912_v33 = vpack.c.bf16 %v225_v28, %v221_v27  ;;  %v224_v35 = vld [vmem:[#allocation5 + $0x360] sm:$0xff]  ;;  %v222_v36 = vld [vmem:[#allocation5 + $0x350] sm:$0xff]  ;;  %v976_v37 = vpack.c.bf16 %v227_v30, %v223_v29  ;;  %v229_v39 = vld [vmem:[#allocation5 + $0x388] sm:$0xff] }
  0xa5   :  { %959 = vmatpush1.bf16.msra.mxu1 %v958_v47  ;;  %897 = vmatprep.subr.bf16.mxu0 %v896_v48  ;;  %v226_v38 = vld [vmem:[#allocation5 + $0x370] sm:$0xff]  ;;  %v233_v40 = vld [vmem:[#allocation5 + $0x3a8] sm:$0xff]  ;;  %v231_v41 = vld [vmem:[#allocation5 + $0x398] sm:$0xff]  ;;  %v914_v43 = vpack.c.bf16 %v224_v35, %v220_v34 }
  0xa6   :  { %961 = vmatprep.subr.bf16.mxu1 %v960_v52  ;;  %v235_v42 = vld [vmem:[#allocation5 + $0x3b8] sm:$0xff]  ;;  %v978_v44 = vpack.c.bf16 %v226_v38, %v222_v36  ;;  %v916_v45 = vpack.c.bf16 %v233_v40, %v229_v39  ;;  %v228_v46 = vld [vmem:[#allocation5 + $0x380] sm:$0xff]  ;;  %v230_v48 = vld [vmem:[#allocation5 + $0x390] sm:$0xff] }
  0xa7   :  { %v232_v47 = vld [vmem:[#allocation5 + $0x3a0] sm:$0xff]  ;;  %v980_v49 = vpack.c.bf16 %v235_v42, %v231_v41  ;;  %v234_v50 = vld [vmem:[#allocation5 + $0x3b0] sm:$0xff]  ;;  %v237_v51 = vld [vmem:[#allocation5 + $0x3c8] sm:$0xff] }
  0xa8   :  { %899 = vmatpush1.bf16.msra.mxu0 %v898_v58  ;;  %v241_v52 = vld [vmem:[#allocation5 + $0x3e8] sm:$0xff]  ;;  %v239_v53 = vld [vmem:[#allocation5 + $0x3d8] sm:$0xff]  ;;  %v918_v55 = vpack.c.bf16 %v232_v47, %v228_v46  ;;  %v982_v56 = vpack.c.bf16 %v234_v50, %v230_v48  ;;  %v236_v58 = vld [vmem:[#allocation5 + $0x3c0] sm:$0xff] }
  0xa9   :  { %963 = vmatpush1.bf16.msra.mxu1 %v962_v59  ;;  %901 = vmatprep.subr.bf16.mxu0 %v900_v60  ;;  %v243_v54 = vld [vmem:[#allocation5 + $0x3f8] sm:$0xff]  ;;  %v920_v57 = vpack.c.bf16 %v241_v52, %v237_v51  ;;  %v240_v59 = vld [vmem:[#allocation5 + $0x3e0] sm:$0xff]  ;;  %v238_v60 = vld [vmem:[#allocation5 + $0x3d0] sm:$0xff] }
  0xaa   :  { %965 = vmatprep.subr.bf16.mxu1 %v964_v0  ;;  %v984_v61 = vpack.c.bf16 %v243_v54, %v239_v53  ;;  %v242_v62 = vld [vmem:[#allocation5 + $0x3f0] sm:$0xff]  ;;  %v428_v63 = vld [vmem:[#allocation8 + $0x80] sm:$0xff]  ;;  %v922_v3 = vpack.c.bf16 %v240_v59, %v236_v58  ;;  %v431_v12 = vld [vmem:[#allocation8 + $0x98] sm:$0xff] }
  0xab   :  { %v429_v0 = vld [vmem:[#allocation8 + $0x88] sm:$0xff]  ;;  %v460_v1 = vld [vmem:[#allocation8 + $0x180] sm:$0xff]  ;;  %v986_v4 = vpack.c.bf16 %v242_v62, %v238_v60  ;;  %v430_v11 = vld [vmem:[#allocation8 + $0x90] sm:$0xff] }
  0xac   :  { %903 = vmatpush1.bf16.msra.mxu0 %v902_v6  ;;  %v461_v2 = vld [vmem:[#allocation8 + $0x188] sm:$0xff]  ;;  %v988_v5 = vpack.c.bf16 %v429_v0, %v428_v63  ;;  %v412_v6 = vld [vmem:[#allocation8] sm:$0xff]  ;;  %v463_v14 = vld [vmem:[#allocation8 + $0x198] sm:$0xff]  ;;  %v992_v18 = vpack.c.bf16 %v431_v12, %v430_v11 }
  0xad   :  { %967 = vmatpush1.bf16.msra.mxu1 %v966_v8  ;;  %905 = vmatprep.subr.bf16.mxu0 %v904_v9  ;;  %v413_v7 = vld [vmem:[#allocation8 + $0x8] sm:$0xff]  ;;  %v444_v8 = vld [vmem:[#allocation8 + $0x100] sm:$0xff]  ;;  %v1020_v9 = vpack.c.bf16 %v461_v2, %v460_v1  ;;  %v447_v23 = vld [vmem:[#allocation8 + $0x118] sm:$0xff] }
  0xae   :  { %969 = vmatprep.subr.bf16.mxu1 %v968_v13  ;;  %v445_v10 = vld [vmem:[#allocation8 + $0x108] sm:$0xff]  ;;  %v462_v13 = vld [vmem:[#allocation8 + $0x190] sm:$0xff]  ;;  %v990_v16 = vpack.c.bf16 %v413_v7, %v412_v6  ;;  %v432_v24 = vld [vmem:[#allocation8 + $0xa0] sm:$0xff] }
  0xaf   :  { %v114_v15 = vld [vmem:[#allocation2] sm:$0xff]  ;;  %v1022_v17 = vpack.c.bf16 %v445_v10, %v444_v8  ;;  %v1024_v22 = vpack.c.bf16 %v463_v14, %v462_v13  ;;  %v464_v26 = vld [vmem:[#allocation8 + $0x1a0] sm:$0xff]  ;;  %v467_v39 = vld [vmem:[#allocation8 + $0x1b8] sm:$0xff] }
  0xb0   :  { %907 = vmatpush1.bf16.msra.mxu0 %v906_v19  ;;  %v414_v19 = vld [vmem:[#allocation8 + $0x10] sm:$0xff]  ;;  %v465_v27 = vld [vmem:[#allocation8 + $0x1a8] sm:$0xff]  ;;  %v451_v47 = vld [vmem:[#allocation8 + $0x138] sm:$0xff] }
  0xb1   :  { %971 = vmatpush1.bf16.msra.mxu1 %v970_v20  ;;  %909 = vmatprep.subr.bf16.mxu0 %v908_v21  ;;  %v415_v20 = vld [vmem:[#allocation8 + $0x18] sm:$0xff]  ;;  %v446_v21 = vld [vmem:[#allocation8 + $0x110] sm:$0xff]  ;;  %v1028_v34 = vpack.c.bf16 %v465_v27, %v464_v26  ;;  %v449_v35 = vld [vmem:[#allocation8 + $0x128] sm:$0xff] }
  0xb2   :  { %973 = vmatprep.subr.bf16.mxu1 %v972_v25  ;;  %v433_v25 = vld [vmem:[#allocation8 + $0xa8] sm:$0xff]  ;;  %v994_v28 = vpack.c.bf16 %v415_v20, %v414_v19  ;;  %v1026_v29 = vpack.c.bf16 %v447_v23, %v446_v21  ;;  %v434_v36 = vld [vmem:[#allocation8 + $0xb0] sm:$0xff]  ;;  %v436_v48 = vld [vmem:[#allocation8 + $0xc0] sm:$0xff] }
  0xb3   :  { %v996_v30 = vpack.c.bf16 %v433_v25, %v432_v24  ;;  %v466_v38 = vld [vmem:[#allocation8 + $0x1b0] sm:$0xff]  ;;  %v468_v50 = vld [vmem:[#allocation8 + $0x1c0] sm:$0xff]  ;;  %v469_v51 = vld [vmem:[#allocation8 + $0x1c8] sm:$0xff] }
  0xb4   :  { %911 = vmatpush1.bf16.msra.mxu0 %v910_v31  ;;  %v416_v31 = vld [vmem:[#allocation8 + $0x20] sm:$0xff]  ;;  %v1032_v46 = vpack.c.bf16 %v467_v39, %v466_v38  ;;  %v1036_v58 = vpack.c.bf16 %v469_v51, %v468_v50  ;;  %v453_v59 = vld [vmem:[#allocation8 + $0x148] sm:$0xff]  ;;  %v438_v60 = vld [vmem:[#allocation8 + $0xd0] sm:$0xff] }
  0xb5   :  { %975 = vmatpush1.bf16.msra.mxu1 %v974_v32  ;;  %913 = vmatprep.subr.bf16.mxu0 %v912_v33  ;;  %v417_v32 = vld [vmem:[#allocation8 + $0x28] sm:$0xff]  ;;  %v448_v33 = vld [vmem:[#allocation8 + $0x120] sm:$0xff]  ;;  %v470_v62 = vld [vmem:[#allocation8 + $0x1d0] sm:$0xff] }
  0xb6   :  { %977 = vmatprep.subr.bf16.mxu1 %v976_v37  ;;  %v435_v37 = vld [vmem:[#allocation8 + $0xb8] sm:$0xff]  ;;  %v998_v40 = vpack.c.bf16 %v417_v32, %v416_v31  ;;  %v1030_v41 = vpack.c.bf16 %v449_v35, %v448_v33  ;;  %v440_v8 = vld [vmem:[#allocation8 + $0xe0] sm:$0xff]  ;;  %v473_v11 = vld [vmem:[#allocation8 + $0x1e8] sm:$0xff]  ;;  %v246_v35 = vlaneseq }
  0xb7   :  { %v1000_v42 = vpack.c.bf16 %v435_v37, %v434_v36  ;;  %v471_v63 = vld [vmem:[#allocation8 + $0x1d8] sm:$0xff]  ;;  %v472_v10 = vld [vmem:[#allocation8 + $0x1e0] sm:$0xff]  ;;  %v457_v20 = vld [vmem:[#allocation8 + $0x168] sm:$0xff] }
  0xb8   :  { %915 = vmatpush1.bf16.msra.mxu0 %v914_v43  ;;  %v418_v43 = vld [vmem:[#allocation8 + $0x30] sm:$0xff]  ;;  %v1040_v6 = vpack.c.bf16 %v471_v63, %v470_v62  ;;  %v455_v7 = vld [vmem:[#allocation8 + $0x158] sm:$0xff]  ;;  %v247_v36 = vshrl.u32 %v246_v35, 7  ;;  %v624_v50 = vld [vmem:[#allocation11] sm:$0xff] }
  0xb9   :  { %979 = vmatpush1.bf16.msra.mxu1 %v978_v44  ;;  %917 = vmatprep.subr.bf16.mxu0 %v916_v45  ;;  %v419_v44 = vld [vmem:[#allocation8 + $0x38] sm:$0xff]  ;;  %v450_v45 = vld [vmem:[#allocation8 + $0x130] sm:$0xff] }
  0xba   :  { %981 = vmatprep.subr.bf16.mxu1 %v980_v49  ;;  %v437_v49 = vld [vmem:[#allocation8 + $0xc8] sm:$0xff]  ;;  %v1002_v52 = vpack.c.bf16 %v419_v44, %v418_v43  ;;  %v1034_v53 = vpack.c.bf16 %v451_v47, %v450_v45  ;;  %v443_v23 = vld [vmem:[#allocation8 + $0xf8] sm:$0xff]  ;;  %v474_v24 = vld [vmem:[#allocation8 + $0x1f0] sm:$0xff]  ;;  %v248_v37 = vsub.s32 0, %v247_v36  ;;  %v256_v39 = vsub.s32 2, %v247_v36 }
  0xbb   :  { %v1004_v54 = vpack.c.bf16 %v437_v49, %v436_v48  ;;  %v475_v26 = vld [vmem:[#allocation8 + $0x1f8] sm:$0xff]  ;;  %v426_v27 = vld [vmem:[#allocation8 + $0x70] sm:$0xff] }
  0xbc   :  { %919 = vmatpush1.bf16.msra.mxu0 %v918_v55  ;;  %v420_v55 = vld [vmem:[#allocation8 + $0x40] sm:$0xff]  ;;  %v458_v31 = vld [vmem:[#allocation8 + $0x170] sm:$0xff]  ;;  %v459_v32 = vld [vmem:[#allocation8 + $0x178] sm:$0xff] }
  0xbd   :  { %983 = vmatpush1.bf16.msra.mxu1 %v982_v56  ;;  %921 = vmatprep.subr.bf16.mxu0 %v920_v57  ;;  %v421_v56 = vld [vmem:[#allocation8 + $0x48] sm:$0xff]  ;;  %v452_v57 = vld [vmem:[#allocation8 + $0x140] sm:$0xff]  ;;  %v1050_v33 = vpack.c.bf16 %v459_v32, %v458_v31  ;;  %v244_v38 = vld [vmem:[#allocation7] sm:$0xf] }
  0xbe   :  { %985 = vmatprep.subr.bf16.mxu1 %v984_v61  ;;  %v439_v61 = vld [vmem:[#allocation8 + $0xd8] sm:$0xff]  ;;  %v1006_v0 = vpack.c.bf16 %v421_v56, %v420_v55  ;;  %v1038_v1 = vpack.c.bf16 %v453_v59, %v452_v57  ;;  %v257_v43 = vrot.slane %v244_v38, %v256_v39  ;;  %v625_v51 = vld [vmem:[#allocation11 + $0x8] sm:$0xff] }
  0xbf   :  { %v1008_v2 = vpack.c.bf16 %v439_v61, %v438_v60  ;;  %v626_v61 = vld [vmem:[#allocation11 + $0x10] sm:$0xff]  ;;  %v627_v62 = vld [vmem:[#allocation11 + $0x18] sm:$0xff] }
  0xc0   :  { %923 = vmatpush1.bf16.msra.mxu0 %v922_v3  ;;  %v422_v3 = vld [vmem:[#allocation8 + $0x50] sm:$0xff]  ;;  %v1056_v63 = vpack.c.bf16 %v627_v62, %v626_v61 }
  0xc1   :  { %987 = vmatpush1.bf16.msra.mxu1 %v986_v4  ;;  %989 = vmatprep.subr.bf16.mxu0 %v988_v5  ;;  %v423_v4 = vld [vmem:[#allocation8 + $0x58] sm:$0xff]  ;;  %v454_v5 = vld [vmem:[#allocation8 + $0x150] sm:$0xff] }
  0xc2   :  { %1021 = vmatprep.subr.bf16.mxu1 %v1020_v9  ;;  %v441_v9 = vld [vmem:[#allocation8 + $0xe8] sm:$0xff]  ;;  %v1010_v12 = vpack.c.bf16 %v423_v4, %v422_v3  ;;  %v1042_v13 = vpack.c.bf16 %v455_v7, %v454_v5  ;;  %v630_v3 = vld [vmem:[#allocation11 + $0x30] sm:$0xff]  ;;  %v631_v4 = vld [vmem:[#allocation11 + $0x38] sm:$0xff] }
  0xc3   :  { %331 = vmatmul.mubr.f32.vlgmr.msra.gmra.mrb[0].mxu0 %v114_v15  ;;  %v1012_v14 = vpack.c.bf16 %v441_v9, %v440_v8  ;;  %v1062_v5 = vpack.c.bf16 %v631_v4, %v630_v3  ;;  %v633_v7 = vld [vmem:[#allocation11 + $0x48] sm:$0xff]  ;;  %v634_v9 = vld [vmem:[#allocation11 + $0x50] sm:$0xff] }
  0xc4   :  { %402 = vmatmul.mubr.f32.vlgmr.msra.gmra.mrb[0].mxu1 %v114_v15  ;;  %991 = vmatpush3.bf16.msra.mxu0 %v990_v16  ;;  %v1044_v15 = vpack.c.bf16 %v473_v11, %v472_v10  ;;  %v424_v16 = vld [vmem:[#allocation8 + $0x60] sm:$0xff] }
  0xc5   :  { %1023 = vmatpush3.bf16.msra.mxu1 %v1022_v17  ;;  %993 = vmatprep.subr.bf16.mxu0 %v992_v18  ;;  %v425_v17 = vld [vmem:[#allocation8 + $0x68] sm:$0xff]  ;;  %v456_v18 = vld [vmem:[#allocation8 + $0x160] sm:$0xff] }
  0xc6   :  { %1025 = vmatprep.subr.bf16.mxu1 %v1024_v22  ;;  %v1014_v19 = vpack.c.bf16 %v425_v17, %v424_v16  ;;  %v1046_v21 = vpack.c.bf16 %v457_v20, %v456_v18  ;;  %v442_v22 = vld [vmem:[#allocation8 + $0xf0] sm:$0xff]  ;;  %v635_v10 = vld [vmem:[#allocation11 + $0x58] sm:$0xff]  ;;  %v1290_v18 = vmov 0.0  }
  0xc7   :  { %v1016_v25 = vpack.c.bf16 %v443_v23, %v442_v22  ;;  %v1068_v11 = vpack.c.bf16 %v635_v10, %v634_v9  ;;  %v639_v16 = vld [vmem:[#allocation11 + $0x78] sm:$0xff] }
  0xc8   :  { %995 = vmatpush3.bf16.msra.mxu0 %v994_v28  ;;  %v427_v28 = vld [vmem:[#allocation8 + $0x78] sm:$0xff] }
  0xc9   :  { %1027 = vmatpush3.bf16.msra.mxu1 %v1026_v29  ;;  %997 = vmatprep.subr.bf16.mxu0 %v996_v30  ;;  %v1048_v29 = vpack.c.bf16 %v475_v26, %v474_v24  ;;  %v1018_v30 = vpack.c.bf16 %v427_v28, %v426_v27 }
  0xca   :  { %1029 = vmatprep.subr.bf16.mxu1 %v1028_v34  ;;  %v1288_v34 = vmov 0.0|0.0  }
  0xcc   :  { %999 = vmatpush3.bf16.msra.mxu0 %v998_v40  ;;  %v252_v40 = vsub.s32 1, %v247_v36 }
  0xcd   :  { %1031 = vmatpush3.bf16.msra.mxu1 %v1030_v41  ;;  %1001 = vmatprep.subr.bf16.mxu0 %v1000_v42  ;;  %v260_v41 = vsub.s32 3, %v247_v36  ;;  %v249_v42 = vrot.slane %v244_v38, %v248_v37 }
  0xce   :  { %1033 = vmatprep.subr.bf16.mxu1 %v1032_v46  ;;  %v253_v44 = vrot.slane %v244_v38, %v252_v40 }
  0xcf   :  { %v261_v45 = vrot.slane %v244_v38, %v260_v41 }
  0xd0   :  { %1003 = vmatpush3.bf16.msra.mxu0 %v1002_v52 }
  0xd1   :  { %1035 = vmatpush3.bf16.msra.mxu1 %v1034_v53  ;;  %1005 = vmatprep.subr.bf16.mxu0 %v1004_v54 }
  0xd2   :  { %1037 = vmatprep.subr.bf16.mxu1 %v1036_v58  ;;  %v1053_v58 = vpack.c.bf16 %v625_v51, %v624_v50 }
  0xd4   :  { %1007 = vmatpush3.bf16.msra.mxu0 %v1006_v0  ;;  %v628_v0 = vld [vmem:[#allocation11 + $0x20] sm:$0xff] }
  0xd5   :  { %1039 = vmatpush3.bf16.msra.mxu1 %v1038_v1  ;;  %1009 = vmatprep.subr.bf16.mxu0 %v1008_v2  ;;  %v629_v1 = vld [vmem:[#allocation11 + $0x28] sm:$0xff] }
  0xd6   :  { %1041 = vmatprep.subr.bf16.mxu1 %v1040_v6  ;;  %v1059_v2 = vpack.c.bf16 %v629_v1, %v628_v0  ;;  %v632_v6 = vld [vmem:[#allocation11 + $0x40] sm:$0xff] }
  0xd7   :  { %v1065_v8 = vpack.c.bf16 %v633_v7, %v632_v6 }
  0xd8   :  { %1011 = vmatpush3.bf16.msra.mxu0 %v1010_v12  ;;  %v636_v12 = vld [vmem:[#allocation11 + $0x60] sm:$0xff] }
  0xd9   :  { %1043 = vmatpush3.bf16.msra.mxu1 %v1042_v13  ;;  %1013 = vmatprep.subr.bf16.mxu0 %v1012_v14  ;;  %v637_v13 = vld [vmem:[#allocation11 + $0x68] sm:$0xff] }
  0xda   :  { %1045 = vmatprep.subr.bf16.mxu1 %v1044_v15  ;;  %v1071_v14 = vpack.c.bf16 %v637_v13, %v636_v12  ;;  %v638_v15 = vld [vmem:[#allocation11 + $0x70] sm:$0xff] }
  0xdb   :  { %v1074_v17 = vpack.c.bf16 %v639_v16, %v638_v15 }
  0xdc   :  { %1015 = vmatpush3.bf16.msra.mxu0 %v1014_v19 }
  0xdd   :  { %1047 = vmatpush3.bf16.msra.mxu1 %v1046_v21  ;;  %1017 = vmatprep.subr.bf16.mxu0 %v1016_v25  ;;  %v736_v21 = vld [vmem:[#allocation10] ss:$0 sm:$0xff] }
  0xde   :  { %1049 = vmatprep.subr.bf16.mxu1 %v1048_v29  ;;  %v737_v29 = vld [vmem:[#allocation13] ss:$0 sm:$0xff] }
  0xe0   :  { %1019 = vmatpush3.bf16.msra.mxu0 %v1018_v30 }
  0xe1   :  { %1051 = vmatpush3.bf16.msra.mxu1 %v1050_v33  ;;  %1052 = vmatprep.subr.bf16.mxu0 %v1288_v34 }
 0x196   :  { %v332_v46 = vpop.f32.mrb[0].mxu0 }
 0x197   :  { %v333_v47 = vadd.f32 %v332_v46, %v249_v42  ;;  %v403_v48 = vpop.f32.mrb[0].mxu1  ;;  %v334_v49 = vpop.f32.mrb[1].mxu0 }
 0x198   :  { %v404_v52 = vadd.f32 %v403_v48, %v257_v43  ;;  %v335_v53 = vadd.f32 %v334_v49, %v253_v44  ;;  %v405_v54 = vpop.f32.mrb[1].mxu1 }
 0x199   :  { %v406_v55 = vadd.f32 %v405_v54, %v261_v45  ;;  %v408_v59 = vmax.f32 %v333_v47, 0.0 }
 0x19a   :  { %v410_v56 = vmax.f32 %v404_v52, 0.0  ;;  %v409_v57 = vmax.f32 %v335_v53, 0.0 }
 0x19b   :  { %v411_v60 = vmax.f32 %v406_v55, 0.0 }
 0x19c   :  { %547 = vmatprep.mubr.f32.mxu0 %v409_v57 }
 0x19d   :  { %617 = vmatprep.mubr.f32.mxu1 %v411_v60  ;;  %548 = vmatmul.mubr.f32.vlgmr.msra.gmra.mrb[2].mxu0 %v408_v59 }
 0x19e   :  { %618 = vmatmul.mubr.f32.vlgmr.msra.gmra.mrb[2].mxu1 %v410_v56  ;;  %1054 = vmatpush3.bf16.msra.mxu0 %v1053_v58 }
 0x19f   :  { %1055 = vmatprep.subr.bf16.mxu0 %v1288_v34  ;;  %857 = vmatprep.mubr.msk.f32.mxu0 %vm1289_vm0, %v1290_v18 }
 0x1a2   :  { %1057 = vmatpush3.bf16.msra.mxu0 %v1056_v63 }
 0x1a3   :  { %1058 = vmatprep.subr.bf16.mxu0 %v1288_v34 }
 0x1a6   :  { %1060 = vmatpush3.bf16.msra.mxu0 %v1059_v2 }
 0x1a7   :  { %1061 = vmatprep.subr.bf16.mxu0 %v1288_v34 }
 0x1aa   :  { %1063 = vmatpush3.bf16.msra.mxu0 %v1062_v5 }
 0x1ab   :  { %1064 = vmatprep.subr.bf16.mxu0 %v1288_v34 }
 0x1ae   :  { %1066 = vmatpush3.bf16.msra.mxu0 %v1065_v8 }
 0x1af   :  { %1067 = vmatprep.subr.bf16.mxu0 %v1288_v34 }
 0x1b2   :  { %1069 = vmatpush3.bf16.msra.mxu0 %v1068_v11 }
 0x1b3   :  { %1070 = vmatprep.subr.bf16.mxu0 %v1288_v34 }
 0x1b6   :  { %1072 = vmatpush3.bf16.msra.mxu0 %v1071_v14 }
 0x1b7   :  { %1073 = vmatprep.subr.bf16.mxu0 %v1288_v34 }
 0x1ba   :  { %1075 = vmatpush3.bf16.msra.mxu0 %v1074_v17 }
 0x270   :  { %v770_v19 = vpop.f32.mrb[2].mxu0 }
 0x271   :  { %v805_v20 = vpop.f32.mrb[2].mxu1  ;;  %v771_v22 = vpop.f32.mrb[3].mxu0 }
 0x272   :  { %v772_v23 = vadd.f32 %v771_v22, %v770_v19  ;;  %v806_v24 = vpop.f32.mrb[3].mxu1 }
 0x273   :  { %v807_v25 = vadd.f32 %v806_v24, %v805_v20 }
 0x274   :  { %v550_v26 = vadd.f32 %v772_v23, %v736_v21 }
 0x276   :  { %v620_v27 = vadd.f32 %v807_v25, %v550_v26 }
 0x278   :  { %v623_v28 = vmax.f32 %v620_v27, 0.0 }
 0x27a   :  { %858 = vmatmul.mubr.f32.vlgmr.msra.gmra.mrb[4].mxu0 %v623_v28 }
 0x34d   :  { %v713_v30 = vpop.f32.mrb[4].mxu0 }
 0x34e   :  { %v714_v31 = vadd.f32 %v737_v29, %v713_v30  ;;  %v859_v32 = vpop.f32.mrb[5].mxu0 }
 0x350   :  { %717 = vst [vmem:[#allocation14] sm:$0xff] %v714_v31 }
 0x351   :  { %1256 = shalt.err (!%p1253_p4)
}
 0x352   :  { %s1257_s15 = scalar_lea.hbm %s1435_s7, 128 }
 0x353   :  { %p1258_p5 = scmp.ne.s32.totalorder %s1435_s7, %s1257_s15  ;;  %p1261_p6 = scmp.lt.u32.totalorder %s1257_s15, %s1435_s7 }
 0x355   :  { %p1263_p7 = pnand %p1261_p6, %p1258_p5 }
 0x357   :  { %1266 = shalt.err (!%p1263_p7)
}
 0x358   :  { %727 = dma.vmem_to_hbm [thread:$0]  %s725_s13, 128, %s1435_s7, [#allocation4]  }
 0x359   :  { %1275 = dma.done.wait [#allocation4], 128  }
 0x35a   :  { %1276 = vsyncadd [#allocation4], 4294967168 }
 0x35b   :  { %731 = vsyncpa [#allocation3], 1 }
 0x35c   :  { %732 = vsyncpa [#allocation6], 1 }
 0x35d   :  { %733 = vsyncpa [#allocation9], 1 }
 0x35e   :  { %734 = vsyncpa [#allocation12], 1 }
 0x35f   :  { %735 = vsyncpa [#allocation4], 1 }

</bundles_post_ra>
